<compile_context>
chip_gen: v7x
topology: tpu7x:2x2x1
jax: 0.10.0
libtpu: 0.0.40
codegen_flags: <defaults>
</compile_context>

<pallas_src>
import functools

import numpy as np
import jax
import jax.numpy as jnp
from jax.experimental import pallas as pl
from jax.experimental.pallas import tpu as pltpu

TEMPERATURE = 0.1
BASE_TEMPERATURE = 0.07
IGNORE_LABEL = 255
MAX_SAMPLES = 1024
MAX_VIEWS = 100
TR = 128          # anchor-row tile for the contrastive kernel


# ----------------------------------------------------------------------------
# Pallas kernel 1: cross-entropy with ignore_index.
# grid = (B, HW // tn): batch axis "parallel" (megacore), pixel axis
# "arbitrary".  The two outputs are lane-wise partial sums (loss, valid count)
# kept resident in VMEM across the pixel axis; the tiny final reduce runs in
# XLA, so the per-tile work is pure VPU (no scalar SMEM read-modify-write).
# ----------------------------------------------------------------------------
def _ce_kernel(logits_ref, labels_ref, loss_ref, cnt_ref):
    i = pl.program_id(1)

    @pl.when(i == 0)
    def _():
        loss_ref[...] = jnp.zeros_like(loss_ref)
        cnt_ref[...] = jnp.zeros_like(cnt_ref)

    logits = logits_ref[0]                            # (C, tn) f32
    labels = labels_ref[0]                            # (1, tn) i32

    m = jnp.max(logits, axis=0, keepdims=True)
    lse = m + jnp.log(jnp.sum(jnp.exp(logits - m), axis=0, keepdims=True))
    cls_ids = jax.lax.broadcasted_iota(jnp.int32, logits.shape, 0)
    logit_t = jnp.sum(jnp.where(cls_ids == labels, logits, 0.0),
                      axis=0, keepdims=True)
    valid = labels != IGNORE_LABEL
    per_pix = jnp.where(valid, lse - logit_t, 0.0)    # (1, tn)

    loss_ref[0] += per_pix
    cnt_ref[0] += valid.astype(jnp.float32)


def _pick_tile(n, max_tile=2048):
    """Largest multiple of 128 that divides n and is <= max_tile."""
    best = 128
    t = 128
    while t <= min(n, max_tile):
        if n % t == 0:
            best = t
        t += 128
    return best


def cross_entropy_loss(pred, target, max_tile=2048):
    """pred: (B, C, H, W) logits; target: (B, H, W) int with 255 = ignore."""
    B, C, H, W = pred.shape
    HW = H * W
    logits = pred.reshape(B, C, HW)                   # free reshape in NCHW
    labels = target.reshape(B, 1, HW).astype(jnp.int32)
    if HW % 128 != 0:                                 # pad pixels with ignore
        padn = (-HW) % 128
        logits = jnp.pad(logits, ((0, 0), (0, 0), (0, padn)))
        labels = jnp.pad(labels, ((0, 0), (0, 0), (0, padn)),
                         constant_values=IGNORE_LABEL)
        HW += padn
    tn = _pick_tile(HW, max_tile)

    # TODO(synk): fuse the align_corners bilinear upsample into this kernel via
    #             scalar-prefetched y0/y1/x0/x1 tables so pred never hits HBM.
    loss_part, cnt_part = pl.pallas_call(
        _ce_kernel,
        out_shape=(jax.ShapeDtypeStruct((B, 1, tn), jnp.float32),
                   jax.ShapeDtypeStruct((B, 1, tn), jnp.float32)),
        grid_spec=pltpu.PrefetchScalarGridSpec(
            num_scalar_prefetch=0,
            grid=(B, HW // tn),
            in_specs=[
                pl.BlockSpec((1, C, tn), lambda b, i: (b, 0, i)),
                pl.BlockSpec((1, 1, tn), lambda b, i: (b, 0, i)),
            ],
            out_specs=[
                pl.BlockSpec((1, 1, tn), lambda b, i: (b, 0, 0)),
                pl.BlockSpec((1, 1, tn), lambda b, i: (b, 0, 0)),
            ],
        ),
        compiler_params=pltpu.CompilerParams(
            dimension_semantics=("parallel", "arbitrary")),
    )(logits, labels)

    total = jnp.sum(loss_part)
    count = jnp.sum(cnt_part)
    return total / jnp.maximum(count, 1.0)            # guard all-ignore target


# ----------------------------------------------------------------------------
# Pallas kernel 2: supervised contrastive loss (_contrastive), tiled over
# anchor rows (parallel grid axis).  Positive/negative masks are built
# in-kernel from the int32 label vector (-1 marks padded anchors).
# ----------------------------------------------------------------------------
def _contrastive_kernel(rowfeat_ref, allfeat_ref, rowlab_ref, collab_ref,
                        out_ref):
    r = pl.program_id(0)
    tr = rowfeat_ref.shape[0]

    # (TR, M) similarity on the MXU (bf16 inputs, f32 accumulate).
    dots = jax.lax.dot_general(
        rowfeat_ref[...], allfeat_ref[...], (((1,), (1,)), ((), ())),
        preferred_element_type=jnp.float32) * (1.0 / TEMPERATURE)

    row_lab = rowlab_ref[...]                         # (TR, 1) i32
    col_lab = collab_ref[...]                         # (1, M)  i32
    row_valid = row_lab >= 0
    col_valid = col_lab >= 0

    # padded columns contribute nothing
    dots = jnp.where(col_valid, dots, -1e30)

    same = row_lab == col_lab                         # (TR, M)
    row_ids = r * tr + jax.lax.broadcasted_iota(jnp.int32, dots.shape, 0)
    col_ids = jax.lax.broadcasted_iota(jnp.int32, dots.shape, 1)
    diag = row_ids == col_ids
    pos = same & jnp.logical_not(diag) & row_valid & col_valid
    neg = jnp.logical_not(same) & col_valid

    row_max = jnp.max(dots, axis=1, keepdims=True)
    logits = dots - row_max
    exp_logits = jnp.exp(logits)
    neg_sum = jnp.sum(jnp.where(neg, exp_logits, 0.0), axis=1, keepdims=True)
    log_prob = logits - jnp.log(exp_logits + neg_sum)

    pos_f = pos.astype(jnp.float32)
    pos_cnt = jnp.sum(pos_f, axis=1, keepdims=True)
    pos_sum = jnp.sum(jnp.where(pos, log_prob, 0.0), axis=1, keepdims=True)
    inv_cnt = pl.reciprocal(jnp.maximum(pos_cnt, 1.0), approx=True)
    mean_log_prob_pos = pos_sum * inv_cnt

    row_loss = jnp.where(
        row_valid, -(TEMPERATURE / BASE_TEMPERATURE) * mean_log_prob_pos, 0.0)
    out_ref[...] = row_loss                           # (TR, 1)


def contrastive_loss(feat_bf16, row_labels, col_labels, num_anchor_rows):
    M_pad, D = feat_bf16.shape
    nb = M_pad // TR
    per_row = pl.pallas_call(
        _contrastive_kernel,
        out_shape=jax.ShapeDtypeStruct((M_pad, 1), jnp.float32),
        grid_spec=pltpu.PrefetchScalarGridSpec(
            num_scalar_prefetch=0,
            grid=(nb,),
            in_specs=[
                pl.BlockSpec((TR, D), lambda r: (r, 0)),      # anchor rows
                pl.BlockSpec((M_pad, D), lambda r: (0, 0)),   # full contrast set
                pl.BlockSpec((TR, 1), lambda r: (r, 0)),      # row labels
                pl.BlockSpec((1, M_pad), lambda r: (0, 0)),   # all labels
            ],
            out_specs=pl.BlockSpec((TR, 1), lambda r: (r, 0)),
        ),
        compiler_params=pltpu.CompilerParams(
            dimension_semantics=("parallel",),
            vmem_limit_bytes=32 * 1024 * 1024),
    )(feat_bf16, feat_bf16, row_labels, col_labels)
    return jnp.sum(per_row) / num_anchor_rows


# ----------------------------------------------------------------------------
# JAX glue: bilinear (align_corners=True) upsample / nearest label resize.
# ----------------------------------------------------------------------------
def bilinear_align_corners(x, out_h, out_w):
    B, C, h, w = x.shape

    def coords(out_n, in_n):
        if out_n == 1:
            return jnp.zeros((out_n,), jnp.float32)
        return jnp.arange(out_n, dtype=jnp.float32) * ((in_n - 1) / (out_n - 1))

    ys, xs = coords(out_h, h), coords(out_w, w)
    y0 = jnp.floor(ys).astype(jnp.int32)
    y1 = jnp.minimum(y0 + 1, h - 1)
    wy = ys - y0.astype(jnp.float32)
    x0 = jnp.floor(xs).astype(jnp.int32)
    x1 = jnp.minimum(x0 + 1, w - 1)
    wx = xs - x0.astype(jnp.float32)

    top = x[:, :, y0, :]
    bot = x[:, :, y1, :]
    rows = top * (1.0 - wy)[None, None, :, None] + bot * wy[None, None, :, None]
    left = rows[:, :, :, x0]
    right = rows[:, :, :, x1]
    return left * (1.0 - wx)[None, None, None, :] + right * wx[None, None, None, :]


def nearest_resize_labels(t, out_h, out_w):
    B, H, W = t.shape
    yi = jnp.floor(jnp.arange(out_h) * (H / out_h)).astype(jnp.int32)
    xi = jnp.floor(jnp.arange(out_w) * (W / out_w)).astype(jnp.int32)
    return t[:, yi, :][:, :, xi]


@jax.jit
def _seg_forward(seg, target):
    """Upsampled-logit CE + (predict, downsampled labels) for the sampler."""
    B, C, h, w = seg.shape
    H, W = target.shape[1], target.shape[2]
    pred = bilinear_align_corners(seg, H, W)
    ce = cross_entropy_loss(pred, target)
    predict = jnp.argmax(seg, axis=1).reshape(B, h * w).astype(jnp.int32)
    labels_ds = nearest_resize_labels(target, h, w).reshape(B, h * w)
    labels_ds = labels_ds.astype(jnp.int32)
    return ce, predict, labels_ds


@jax.jit
def _contrast_device(embed, flat_idx, rowlab, collab, num_anchor_rows):
    """Gather sampled pixel embeddings on device and run the contrast kernel."""
    B, D, h, w = embed.shape
    feats_flat = jnp.transpose(embed, (0, 2, 3, 1)).reshape(B * h * w, D)
    feat_sel = jnp.take(feats_flat, flat_idx, axis=0).astype(jnp.bfloat16)
    return contrastive_loss(feat_sel, rowlab, collab, num_anchor_rows)


# ----------------------------------------------------------------------------
# Host-side glue: hard anchor sampling -> only small int32 indices/labels.
# TODO(synk): torch.randperm + data-dependent output shapes have no clean
#             Pallas equivalent; index selection stays on host (numpy), only
#             small int32 arrays cross the host boundary.
# ----------------------------------------------------------------------------
def _hard_anchor_sampling_indices(y_hat, y, n_per_image, rng):
    batch_size = y_hat.shape[0]
    classes, total = [], 0
    for ii in range(batch_size):
        this_y = y_hat[ii]
        cls = [int(c) for c in np.unique(this_y)
               if c != IGNORE_LABEL and int((this_y == c).sum()) > MAX_VIEWS]
        classes.append(cls)
        total += len(cls)
    if total == 0:
        return None
    n_view = min(MAX_SAMPLES // total, MAX_VIEWS)
    idx_out = np.zeros((total, n_view), dtype=np.int32)
    lab_out = np.zeros((total,), dtype=np.int32)
    ptr = 0
    for ii in range(batch_size):
        this_y_hat, this_y = y_hat[ii], y[ii]
        for cls_id in classes[ii]:
            hard = np.nonzero((this_y_hat == cls_id) & (this_y != cls_id))[0]
            easy = np.nonzero((this_y_hat == cls_id) & (this_y == cls_id))[0]
            nh, ne = len(hard), len(easy)
            if nh >= n_view / 2 and ne >= n_view / 2:
                nhk = n_view // 2
                nek = n_view - nhk
            elif nh >= n_view / 2:
                nek = ne
                nhk = n_view - nek
            elif ne >= n_view / 2:
                nhk = nh
                nek = n_view - nhk
            else:
                raise Exception("not enough samples for class %d" % cls_id)
            hard = hard[rng.permutation(nh)[:nhk]]
            easy = easy[rng.permutation(ne)[:nek]]
            idx = np.concatenate([hard, easy])
            idx_out[ptr] = ii * n_per_image + idx
            lab_out[ptr] = cls_id
            ptr += 1
    return idx_out, lab_out, n_view


# ----------------------------------------------------------------------------
# Full ContrastCELoss forward (components computed once, combined per flag).
# ----------------------------------------------------------------------------
def contrast_ce_components(seg, embed, target, seed=0, return_aux=False):
    B, C, h, w = seg.shape

    ce, predict, labels_ds = _seg_forward(seg, target)

    # only small int32 maps go to host for the data-dependent sampler
    y_hat = np.asarray(jax.device_get(labels_ds))
    y_pred = np.asarray(jax.device_get(predict))
    rng = np.random.RandomState(seed)
    samp = _hard_anchor_sampling_indices(y_hat, y_pred, h * w, rng)

    if samp is None:
        lc = jnp.float32(0.0)
        return (ce, lc, None) if return_aux else (ce, lc)

    idx, labs, n_view = samp
    total = idx.shape[0]
    M = total * n_view
    M_pad = ((M + TR - 1) // TR) * TR
    # view-major order matches torch.cat(torch.unbind(feats_, dim=1), dim=0)
    flat_idx = idx.T.reshape(-1)                       # (M,)
    labels_rep = np.tile(labs, n_view)                 # (M,)
    flat_idx = np.concatenate(
        [flat_idx, np.zeros(M_pad - M, np.int32)]).astype(np.int32)
    labels_rep = np.concatenate(
        [labels_rep, np.full(M_pad - M, -1, np.int32)]).astype(np.int32)

    rowlab = jnp.asarray(labels_rep).reshape(M_pad, 1)
    collab = jnp.asarray(labels_rep).reshape(1, M_pad)
    lc = _contrast_device(embed, jnp.asarray(flat_idx), rowlab, collab,
                          jnp.float32(M))
    if return_aux:
        return ce, lc, (flat_idx[:M], labels_rep[:M])
    return ce, lc


def contrast_ce_loss(seg, embed, target, with_embed=False, seed=0):
    ce, lc = contrast_ce_components(seg, embed, target, seed=seed)
    coef = 0.1 if with_embed else 0.0
    return ce + coef * lc


# ----------------------------------------------------------------------------
# Pure-JAX references for sanity checking.
# ----------------------------------------------------------------------------
def _ce_ref(seg, target):
    H, W = target.shape[1], target.shape[2]
    pred = bilinear_align_corners(seg, H, W)
    lse = jax.scipy.special.logsumexp(pred, axis=1)
    tgt = jnp.clip(target, 0, pred.shape[1] - 1)
    logit_t = jnp.take_along_axis(pred, tgt[:, None], axis=1)[:, 0]
    valid = target != IGNORE_LABEL
    per = jnp.where(valid, lse - logit_t, 0.0)
    return jnp.sum(per) / jnp.maximum(jnp.sum(valid.astype(jnp.float32)), 1.0)


def _contrastive_ref(feat, labels):
    M = feat.shape[0]
    dots = (feat @ feat.T) / TEMPERATURE
    dots = dots - jnp.max(dots, axis=1, keepdims=True)
    same = labels[:, None] == labels[None, :]
    diag = jnp.eye(M, dtype=bool)
    pos = same & ~diag
    neg = ~same
    e = jnp.exp(dots)
    neg_sum = jnp.sum(jnp.where(neg, e, 0.0), axis=1, keepdims=True)
    log_prob = dots - jnp.log(e + neg_sum)
    mlpp = jnp.sum(jnp.where(pos, log_prob, 0.0), axis=1) / jnp.sum(
        pos.astype(jnp.float32), axis=1)
    return jnp.mean(-(TEMPERATURE / BASE_TEMPERATURE) * mlpp)


if __name__ == "__main__":
    key = jax.random.PRNGKey(0)
    B, C, D = 2, 5, 32          # batch, seg classes, embed dim
    h = w = 16                  # low-res feature maps
    H = W = 32                  # full-res target

    k1, k2 = jax.random.split(key)
    seg = jax.random.normal(k1, (B, C, h, w), jnp.float32)
    embed = jax.random.normal(k2, (B, D, h, w), jnp.float32)
    # the real model's projection head L2-normalizes the embedding
    embed = embed / jnp.linalg.norm(embed, axis=1, keepdims=True)

    # target: left half class 0, right half class 1, small ignore patch
    target_np = np.zeros((B, H, W), dtype=np.int32)
    target_np[:, :, W // 2:] = 1
    target_np[0, 0:4, 0:4] = IGNORE_LABEL
    target = jnp.asarray(target_np)

    ce, lc, aux = contrast_ce_components(seg, embed, target, seed=0,
                                         return_aux=True)
    ce = jax.block_until_ready(ce)
    lc = jax.block_until_ready(lc)

    loss = float(ce) + 0.0 * float(lc)       # with_embed=False
    loss_we = float(ce) + 0.1 * float(lc)    # with_embed=True
    assert np.isfinite(loss) and np.isfinite(loss_we), (loss, loss_we)

    # sanity: CE kernel vs pure-JAX reference
    ce_ref = float(_ce_ref(seg, target))
    assert abs(float(ce) - ce_ref) <= 1e-4 * max(1.0, abs(ce_ref)), (
        float(ce), ce_ref)

    # sanity: contrastive kernel vs pure-JAX reference (bf16 MXU -> loose tol)
    if aux is not None:
        flat_idx, labels_rep = aux
        feats_flat = jnp.transpose(embed, (0, 2, 3, 1)).reshape(B * h * w, D)
        feat_sel = jnp.take(feats_flat, jnp.asarray(flat_idx), axis=0)
        lc_ref = float(_contrastive_ref(feat_sel, jnp.asarray(labels_rep)))
        assert abs(float(lc) - lc_ref) <= 5e-2 * max(1.0, abs(lc_ref)), (
            float(lc), lc_ref)

    print("KERNEL_OK")
</pallas_src>

<mosaic_0001>
module attributes {stable_mosaic.version = 11 : i64} {
  func.func @_ce_kernel(%arg0: i32, %arg1: i32, %arg2: memref<1x5x1024xf32, #tpu.memory_space<vmem>>, %arg3: memref<1x1x1024xi32, #tpu.memory_space<vmem>>, %arg4: memref<1x1x1024xf32, #tpu.memory_space<vmem>>, %arg5: memref<1x1x1024xf32, #tpu.memory_space<vmem>>) attributes {dimension_semantics = [#tpu.dimension_semantics<parallel>, #tpu.dimension_semantics<arbitrary>], iteration_bounds = array<i64: 2, 1>, scalar_prefetch = 0 : i64, scratch_operands = 0 : i64, tpu.core_type = #tpu.core_type<tc>, window_params = [{transform_indices = @transform_0, window_bounds = array<i64: 1, 5, 1024>}, {transform_indices = @transform_1, window_bounds = array<i64: 1, 1, 1024>}, {transform_indices = @transform_2, window_bounds = array<i64: 1, 1, 1024>}, {transform_indices = @transform_3, window_bounds = array<i64: 1, 1, 1024>}]} {
    %c0_i32 = arith.constant 0 : i32
    %0 = arith.cmpi eq, %arg1, %c0_i32 : i32
    %1 = arith.extui %0 : i1 to i32
    %c0_i32_0 = arith.constant 0 : i32
    %2 = arith.cmpi ne, %1, %c0_i32_0 : i32
    scf.if %2 {
      %cst_22 = arith.constant 0.000000e+00 : f32
      %42 = vector.broadcast %cst_22 : f32 to vector<1x1x1024xf32>
      %c0_23 = arith.constant 0 : index
      %c0_24 = arith.constant 0 : index
      %c0_25 = arith.constant 0 : index
      %43 = vector.load %arg4[%c0_23, %c0_24, %c0_25] : memref<1x1x1024xf32, #tpu.memory_space<vmem>>, vector<1x1x1024xf32>
      tpu.vector_store %arg4[%c0_23, %c0_24, %c0_25], %42 {strides = array<i32>} : memref<1x1x1024xf32, #tpu.memory_space<vmem>>, vector<1x1x1024xf32>,
      %cst_26 = arith.constant 0.000000e+00 : f32
      %44 = vector.broadcast %cst_26 : f32 to vector<1x1x1024xf32>
      %c0_27 = arith.constant 0 : index
      %c0_28 = arith.constant 0 : index
      %c0_29 = arith.constant 0 : index
      %45 = vector.load %arg5[%c0_27, %c0_28, %c0_29] : memref<1x1x1024xf32, #tpu.memory_space<vmem>>, vector<1x1x1024xf32>
      tpu.vector_store %arg5[%c0_27, %c0_28, %c0_29], %44 {strides = array<i32>} : memref<1x1x1024xf32, #tpu.memory_space<vmem>>, vector<1x1x1024xf32>,
    } else {
    }
    %c0 = arith.constant 0 : index
    %c0_1 = arith.constant 0 : index
    %c0_2 = arith.constant 0 : index
    %3 = vector.load %arg2[%c0, %c0_1, %c0_2] : memref<1x5x1024xf32, #tpu.memory_space<vmem>>, vector<1x5x1024xf32>
    %4 = vector.shape_cast %3 : vector<1x5x1024xf32> to vector<5x1024xf32>
    %c0_3 = arith.constant 0 : index
    %c0_4 = arith.constant 0 : index
    %c0_5 = arith.constant 0 : index
    %5 = vector.load %arg3[%c0_3, %c0_4, %c0_5] : memref<1x1x1024xi32, #tpu.memory_space<vmem>>, vector<1x1x1024xi32>
    %6 = vector.shape_cast %5 : vector<1x1x1024xi32> to vector<1x1024xi32>
    %cst = arith.constant dense<0xFF800000> : vector<1024xf32>
    %7 = vector.multi_reduction <maximumf>, %4, %cst [0] : vector<5x1024xf32> to vector<1024xf32>
    %8 = vector.shape_cast %7 : vector<1024xf32> to vector<1x1024xf32>
    %9 = vector.broadcast %8 : vector<1x1024xf32> to vector<5x1024xf32>
    %10 = arith.subf %4, %9 : vector<5x1024xf32>
    %11 = math.exp %10 : vector<5x1024xf32>
    %cst_6 = arith.constant dense<0.000000e+00> : vector<1024xf32>
    %12 = vector.multi_reduction <add>, %11, %cst_6 [0] : vector<5x1024xf32> to vector<1024xf32>
    %13 = vector.shape_cast %12 : vector<1024xf32> to vector<1x1024xf32>
    %14 = math.log %13 : vector<1x1024xf32>
    %15 = arith.addf %8, %14 : vector<1x1024xf32>
    %16 = tpu.iota {dimensions = array<i32: 0>} : vector<5x1024xi32>
    %17 = vector.broadcast %6 : vector<1x1024xi32> to vector<5x1024xi32>
    %18 = arith.cmpi eq, %16, %17 : vector<5x1024xi32>
    %cst_7 = arith.constant 0.000000e+00 : f32
    %19 = vector.broadcast %cst_7 : f32 to vector<5x1024xf32>
    %20 = arith.select %18, %4, %19 : vector<5x1024xi1>, vector<5x1024xf32>
    %cst_8 = arith.constant dense<0.000000e+00> : vector<1024xf32>
    %21 = vector.multi_reduction <add>, %20, %cst_8 [0] : vector<5x1024xf32> to vector<1024xf32>
    %22 = vector.shape_cast %21 : vector<1024xf32> to vector<1x1024xf32>
    %c255_i32 = arith.constant 255 : i32
    %23 = vector.broadcast %c255_i32 : i32 to vector<1x1024xi32>
    %24 = arith.cmpi ne, %6, %23 : vector<1x1024xi32>
    %25 = arith.subf %15, %22 : vector<1x1024xf32>
    %cst_9 = arith.constant 0.000000e+00 : f32
    %26 = vector.broadcast %cst_9 : f32 to vector<1x1024xf32>
    %27 = arith.select %24, %25, %26 : vector<1x1024xi1>, vector<1x1024xf32>
    %c0_10 = arith.constant 0 : index
    %c0_11 = arith.constant 0 : index
    %c0_12 = arith.constant 0 : index
    %28 = vector.load %arg4[%c0_10, %c0_11, %c0_12] : memref<1x1x1024xf32, #tpu.memory_space<vmem>>, vector<1x1x1024xf32>
    %29 = vector.shape_cast %28 : vector<1x1x1024xf32> to vector<1x1024xf32>
    %30 = arith.addf %29, %27 : vector<1x1024xf32>
    %c0_13 = arith.constant 0 : index
    %c0_14 = arith.constant 0 : index
    %c0_15 = arith.constant 0 : index
    %31 = vector.load %arg4[%c0_13, %c0_14, %c0_15] : memref<1x1x1024xf32, #tpu.memory_space<vmem>>, vector<1x1x1024xf32>
    %32 = vector.shape_cast %31 : vector<1x1x1024xf32> to vector<1x1024xf32>
    %33 = vector.shape_cast %30 : vector<1x1024xf32> to vector<1x1x1024xf32>
    tpu.vector_store %arg4[%c0_13, %c0_14, %c0_15], %33 {strides = array<i32>} : memref<1x1x1024xf32, #tpu.memory_space<vmem>>, vector<1x1x1024xf32>,
    %c0_16 = arith.constant 0 : index
    %c0_17 = arith.constant 0 : index
    %c0_18 = arith.constant 0 : index
    %34 = vector.load %arg5[%c0_16, %c0_17, %c0_18] : memref<1x1x1024xf32, #tpu.memory_space<vmem>>, vector<1x1x1024xf32>
    %35 = vector.shape_cast %34 : vector<1x1x1024xf32> to vector<1x1024xf32>
    %36 = arith.extui %24 : vector<1x1024xi1> to vector<1x1024xi32>
    %37 = arith.sitofp %36 : vector<1x1024xi32> to vector<1x1024xf32>
    %38 = arith.addf %35, %37 : vector<1x1024xf32>
    %c0_19 = arith.constant 0 : index
    %c0_20 = arith.constant 0 : index
    %c0_21 = arith.constant 0 : index
    %39 = vector.load %arg5[%c0_19, %c0_20, %c0_21] : memref<1x1x1024xf32, #tpu.memory_space<vmem>>, vector<1x1x1024xf32>
    %40 = vector.shape_cast %39 : vector<1x1x1024xf32> to vector<1x1024xf32>
    %41 = vector.shape_cast %38 : vector<1x1024xf32> to vector<1x1x1024xf32>
    tpu.vector_store %arg5[%c0_19, %c0_20, %c0_21], %41 {strides = array<i32>} : memref<1x1x1024xf32, #tpu.memory_space<vmem>>, vector<1x1x1024xf32>,
    return
  }
  func.func @transform_0(%arg0: i32, %arg1: i32) -> (i32, i32, i32) {
    %c0_i32 = arith.constant 0 : i32
    %c0_i32_0 = arith.constant 0 : i32
    return %arg0, %c0_i32, %arg1 : i32, i32, i32
  }
  func.func @transform_1(%arg0: i32, %arg1: i32) -> (i32, i32, i32) {
    %c0_i32 = arith.constant 0 : i32
    %c0_i32_0 = arith.constant 0 : i32
    return %arg0, %c0_i32, %arg1 : i32, i32, i32
  }
  func.func @transform_2(%arg0: i32, %arg1: i32) -> (i32, i32, i32) {
    %c0_i32 = arith.constant 0 : i32
    %c0_i32_0 = arith.constant 0 : i32
    %c0_i32_1 = arith.constant 0 : i32
    return %arg0, %c0_i32, %c0_i32_0 : i32, i32, i32
  }
  func.func @transform_3(%arg0: i32, %arg1: i32) -> (i32, i32, i32) {
    %c0_i32 = arith.constant 0 : i32
    %c0_i32_0 = arith.constant 0 : i32
    %c0_i32_1 = arith.constant 0 : i32
    return %arg0, %c0_i32, %c0_i32_0 : i32, i32, i32
  }
}

</mosaic_0001>

<bundles_post_ra>
// kernel: _seg_forward.1
= control target key start
LH: loop header
LB: loop body
LE: loop exit
PB: predicated region body
PF: predicated region fallthrough
CT: control target
= control target key end

     0   :  { %s830_s12 = smov 0   ;;  %s832_s13 = smov 0   ;;  %s1061_s0 = inlined_call_operand.vmem [shape: f32[2,5,1024], index: 0, kind: input, shape index: {}]   ;;  %s1062_s1 = inlined_call_operand.vmem [shape: s32[2,1,1024], index: 1, kind: input, shape index: {}]   ;;  %s1063_s2 = inlined_call_operand.vmem [shape: f32[2,1,1024], index: 2, kind: output, shape index: {0}]   ;;  %s1064_s3 = inlined_call_operand.vmem [shape: f32[2,1,1024], index: 3, kind: output, shape index: {1}]  }
   0x1   :  { %s834_s14 = smov 0  }
   0x2 LB: > { %s26_s15 = sadd.s32 1, %s802_s13  ;;  %p716_p0 = scmp.ge.s32.totalorder %s806_s14, 1  ;;  %s806_s14 = sphi %s834_s14, %s14_s14   ;;  %s802_s13 = sphi %s832_s13, %s1066_s13   ;;  %s798_s12 = sphi %s830_s12, %s1065_s12  }
   0x3   : > { %p28_p1 = scmp.ge.s32.totalorder %s26_s15, 2  ;;  %p175_p2 = scmp.lt.s32.totalorder %s806_s14, 3 }
   0x5   : > { %s1068_s15 = smov (%p28_p1, %s26_s15), 0  ;;  %p176_p3 = pnand %p716_p0, %p175_p2 }
   0x6   : > { %p215_p4 = scmp.lt.s32.totalorder (!%p176_p3), %s798_s12, 1  ;;  %v417_v0 = vlaneseq (!%p176_p3)  ;;  %v808_v1 = vmov (!%p176_p3), 1966171168   ;;  %vm256_vm0 = vcmask (!%p176_p3), 1044480  }
   0x7   : > { %179 = sbr.rel (%p176_p3) target bundleno = 98 (0x62), region = 28  ;;  %v545_v2 = vunpack.c.l.s4 (!%p176_p3), %v808_v1 }
   0x8   : > { %v850_v3 = vshrl.u32 (!%p176_p3), %v417_v0, 7 }
   0x9   : > { %v546_v5 = vunpack.c.0.s8 (!%p176_p3), %v545_v2 }
   0xa   : > { %v421_v4 = vsub.s32 (!%p176_p3), 0, %v850_v3  ;;  %v425_v6 = vsub.s32 (!%p176_p3), 1, %v850_v3  ;;  %v429_v7 = vsub.s32 (!%p176_p3), 2, %v850_v3  ;;  %v433_v8 = vsub.s32 (!%p176_p3), 3, %v850_v3 }
   0xb   : > { %v437_v9 = vsub.s32 (!%p176_p3), 4, %v850_v3  ;;  %v441_v15 = vsub.s32 (!%p176_p3), 5, %v850_v3  ;;  %v445_v16 = vsub.s32 (!%p176_p3), 6, %v850_v3  ;;  %v449_v20 = vsub.s32 (!%p176_p3), 7, %v850_v3 }
   0xc   : > { %v881_v21 = vsub.s32 (!%p176_p3), %v546_v5, %v850_v3 }
   0xe   : > { %s1070_s12 = smov (!%p215_p4, %s798_s12), 1 }
   0xf   : > { %s725_s16 = sshll.u32 %s1070_s12, 6  ;;  %s900_s20 = sshll.u32 %s1070_s12, 3 }
  0x10   : > { %s222_s19 = scalar_lea.vmem %s1061_s0, %s725_s16  ;;  %s231_s23 = scalar_lea.vmem %s1062_s1, %s900_s20 }
  0x11   : > { %v861_v10 = vld [vmem:[%s222_s19] sm:$0x1f]  ;;  %v863_v11 = vld [vmem:[%s222_s19 + $0x8] sm:$0x1f]  ;;  %v865_v12 = vld [vmem:[%s222_s19 + $0x10] sm:$0x1f]  ;;  %s240_s26 = scalar_lea.vmem %s1064_s3, %s900_s20  ;;  %s236_s29 = scalar_lea.vmem %s1063_s2, %s900_s20 }
  0x12   : > { %v867_v13 = vld [vmem:[%s222_s19 + $0x18] sm:$0x1f]  ;;  %v869_v14 = vld [vmem:[%s222_s19 + $0x20] sm:$0x1f]  ;;  %v873_v17 = vld [vmem:[%s222_s19 + $0x28] sm:$0x1f] }
  0x13   : > { %v875_v18 = vld [vmem:[%s222_s19 + $0x30] sm:$0x1f]  ;;  %v257_v19 = vsel %vm256_vm0, %v861_v10, -inf  ;;  %v264_v23 = vsel %vm256_vm0, %v863_v11, -inf  ;;  %v271_v24 = vsel %vm256_vm0, %v865_v12, -inf  ;;  %v278_v25 = vsel %vm256_vm0, %v867_v13, -inf }
  0x14   : > { %v258_v22 = vrot.slane %v257_v19, 4  ;;  %v889_v26 = vld [vmem:[%s222_s19 + $0x38] sm:$0x1f]  ;;  %v265_v27 = vrot.slane %v264_v23, 4  ;;  %v272_v28 = vrot.slane %v271_v24, 4  ;;  %v279_v29 = vrot.slane %v278_v25, 4 }
  0x15   : > { %v285_v30 = vsel %vm256_vm0, %v869_v14, -inf  ;;  %v292_v33 = vsel %vm256_vm0, %v873_v17, -inf  ;;  %v299_v34 = vsel %vm256_vm0, %v875_v18, -inf  ;;  %v306_v42 = vsel %vm256_vm0, %v889_v26, -inf }
  0x16   : > { %v259_v31 = vmax.f32 %v257_v19, %v258_v22  ;;  %v286_v32 = vrot.slane %v285_v30, 4  ;;  %v266_v35 = vmax.f32 %v264_v23, %v265_v27  ;;  %v273_v36 = vmax.f32 %v271_v24, %v272_v28 }
  0x17   : > { %v280_v37 = vmax.f32 %v278_v25, %v279_v29  ;;  %v293_v38 = vrot.slane %v292_v33, 4  ;;  %v300_v41 = vrot.slane %v299_v34, 4  ;;  %v307_v50 = vrot.slane %v306_v42, 4 }
  0x18   : > { %v260_v39 = vrot.slane %v259_v31, 2  ;;  %v287_v40 = vmax.f32 %v285_v30, %v286_v32  ;;  %v267_v43 = vrot.slane %v266_v35, 2  ;;  %v274_v44 = vrot.slane %v273_v36, 2 }
  0x19   : > { %v281_v45 = vrot.slane %v280_v37, 2  ;;  %v294_v46 = vmax.f32 %v292_v33, %v293_v38  ;;  %v301_v49 = vmax.f32 %v299_v34, %v300_v41  ;;  %v308_v58 = vmax.f32 %v306_v42, %v307_v50  ;;  %v926_v33 = vld [vmem:[%s231_s23] sm:$0xff] }
  0x1a   : > { %v261_v47 = vmax.f32 %v259_v31, %v260_v39  ;;  %v288_v48 = vrot.slane %v287_v40, 2  ;;  %v268_v51 = vmax.f32 %v266_v35, %v267_v43  ;;  %v275_v52 = vmax.f32 %v273_v36, %v274_v44 }
  0x1b   : > { %v282_v53 = vmax.f32 %v280_v37, %v281_v45  ;;  %v295_v54 = vrot.slane %v294_v46, 2  ;;  %v302_v57 = vrot.slane %v301_v49, 2  ;;  %v309_v2 = vrot.slane %v308_v58, 2 }
  0x1c   : > { %v262_v55 = vrot.slane %v261_v47, 1  ;;  %v289_v56 = vmax.f32 %v287_v40, %v288_v48  ;;  %v269_v59 = vrot.slane %v268_v51, 1  ;;  %v276_v60 = vrot.slane %v275_v52, 1 }
  0x1d   : > { %v283_v61 = vrot.slane %v282_v53, 1  ;;  %v296_v62 = vmax.f32 %v294_v46, %v295_v54  ;;  %v303_v1 = vmax.f32 %v301_v49, %v302_v57  ;;  %v310_v27 = vmax.f32 %v308_v58, %v309_v2 }
  0x1e   : > { %v902_v63 = vmax.f32 %v261_v47, %v262_v55  ;;  %v290_v0 = vrot.slane %v289_v56, 1  ;;  %v908_v5 = vmax.f32 %v268_v51, %v269_v59  ;;  %v910_v19 = vmax.f32 %v275_v52, %v276_v60 }
  0x1f   : > { %v912_v22 = vmax.f32 %v282_v53, %v283_v61  ;;  %v297_v23 = vrot.slane %v296_v62, 1  ;;  %v304_v25 = vrot.slane %v303_v1, 1  ;;  %v311_v35 = vrot.slane %v310_v27, 1 }
  0x20   : > { %v914_v24 = vmax.f32 %v289_v56, %v290_v0  ;;  %v313_v28 = vsub.f32 %v861_v10, %v902_v63  ;;  %v314_v30 = vsub.f32 %v863_v11, %v908_v5  ;;  %v315_v31 = vsub.f32 %v865_v12, %v910_v19 }
  0x21   : > { %v918_v29 = vmax.f32 %v296_v62, %v297_v23  ;;  %v316_v32 = vsub.f32 %v867_v13, %v912_v22  ;;  %v928_v34 = vmax.f32 %v303_v1, %v304_v25  ;;  %v934_v42 = vmax.f32 %v310_v27, %v311_v35 }
  0x22   : > { %v317_v36 = vsub.f32 %v869_v14, %v914_v24  ;;  %v321_v37 = vmul.f32 1.442695, %v313_v28  ;;  %v323_v39 = vmul.f32 1.442695, %v314_v30  ;;  %v325_v40 = vmul.f32 1.442695, %v315_v31 }
  0x23   : > { %v318_v38 = vsub.f32 %v873_v17, %v918_v29  ;;  %v327_v41 = vmul.f32 1.442695, %v316_v32  ;;  %v319_v43 = vsub.f32 %v875_v18, %v928_v34  ;;  %v422_v46 = vrot.slane %v926_v33, %v421_v4 }
  0x24   : > { %752 = vpow2.f32 %v321_v37  ;;  %v329_v44 = vmul.f32 1.442695, %v317_v36  ;;  %v426_v47 = vrot.slane %v926_v33, %v425_v6  ;;  %v320_v48 = vsub.f32 %v889_v26, %v934_v42 }
  0x25   : > { %754 = vpow2.f32 %v323_v39  ;;  %v331_v45 = vmul.f32 1.442695, %v318_v38  ;;  %v333_v49 = vmul.f32 1.442695, %v319_v43  ;;  %v430_v50 = vrot.slane %v926_v33, %v429_v7 }
  0x26   : > { %756 = vpow2.f32 %v325_v40  ;;  %v434_v51 = vrot.slane %v926_v33, %v433_v8  ;;  %v438_v4 = vrot.slane %v926_v33, %v437_v9  ;;  %v442_v6 = vrot.slane %v926_v33, %v441_v15 }
  0x27   : > { %758 = vpow2.f32 %v327_v41  ;;  %v335_v52 = vmul.f32 1.442695, %v320_v48  ;;  %v446_v53 = vrot.slane %v926_v33, %v445_v16  ;;  %v450_v7 = vrot.slane %v926_v33, %v449_v20 }
  0x28   : > { %760 = vpow2.f32 %v329_v44  ;;  %vm451_vm1 = vcmp.eq.s32.totalorder %v850_v3, %v422_v46  ;;  %vm452_vm2 = vcmp.eq.s32.totalorder %v850_v3, %v426_v47  ;;  %vm453_vm3 = vcmp.eq.s32.totalorder %v850_v3, %v430_v50 }
  0x29   : > { %762 = vpow2.f32 %v331_v45  ;;  %vm454_vm4 = vcmp.eq.s32.totalorder %v850_v3, %v434_v51  ;;  %vm455_vm5 = vcmp.eq.s32.totalorder %v850_v3, %v438_v4  ;;  %vm456_vm6 = vcmp.eq.s32.totalorder %v850_v3, %v442_v6 }
  0x2a   : > { %764 = vpow2.f32 %v333_v49  ;;  %vm457_vm7 = vcmp.eq.s32.totalorder %v850_v3, %v446_v53  ;;  %vm458_vm8 = vcmp.eq.s32.totalorder %v850_v3, %v450_v7  ;;  %v459_v8 = vsel %vm451_vm1, %v861_v10, 0.0 }
  0x2b   : > { %766 = vpow2.f32 %v335_v52  ;;  %v460_v9 = vsel %vm452_vm2, %v863_v11, 0.0  ;;  %v461_v15 = vsel %vm453_vm3, %v865_v12, 0.0  ;;  %v462_v16 = vsel %vm454_vm4, %v867_v13, 0.0 }
  0x2c   : > { %v463_v20 = vsel %vm455_vm5, %v869_v14, 0.0  ;;  %v978_v54 = vsel %vm456_vm6, %v873_v17, 0.0  ;;  %v981_v55 = vsel %vm457_vm7, %v875_v18, 0.0  ;;  %v984_v56 = vsel %vm458_vm8, %v889_v26, 0.0 }
  0x2d   : > { %v467_v3 = vsel %vm256_vm0, %v459_v8, 0.0  ;;  %v474_v11 = vsel %vm256_vm0, %v460_v9, 0.0  ;;  %v481_v12 = vsel %vm256_vm0, %v461_v15, 0.0  ;;  %v990_v13 = vsel %vm256_vm0, %v462_v16, 0.0 }
  0x2e   : > { %v753_v10 = vpop.eup %752  ;;  %v468_v57 = vrot.slane %v467_v3, 4  ;;  %v475_v58 = vrot.slane %v474_v11, 4  ;;  %v482_v18 = vrot.slane %v481_v12, 4  ;;  %v489_v59 = vrot.slane %v990_v13, 4 }
  0x2f   : > { %v755_v14 = vpop.eup %754  ;;  %v337_v17 = vsel %vm256_vm0, %v753_v10, 0.0  ;;  %v996_v0 = vsel %vm256_vm0, %v463_v20, 0.0  ;;  %vm523_vm9 = vcmp.ne.s32.totalorder %v926_v33, 255 }
  0x30   : > { %v757_v26 = vpop.eup %756  ;;  %v338_v60 = vrot.slane %v337_v17, 4  ;;  %v344_v61 = vsel %vm256_vm0, %v755_v14, 0.0  ;;  %v469_v62 = vadd.f32 %v468_v57, %v467_v3  ;;  %v476_v25 = vadd.f32 %v475_v58, %v474_v11 }
  0x31   : > { %v759_v1 = vpop.eup %758  ;;  %v345_v2 = vrot.slane %v344_v61, 4  ;;  %v351_v23 = vsel %vm256_vm0, %v757_v26, 0.0  ;;  %v999_v27 = vadd.f32 %v482_v18, %v481_v12 }
  0x32   : > { %v761_v28 = vpop.eup %760  ;;  %v339_v30 = vadd.f32 %v338_v60, %v337_v17  ;;  %v352_v31 = vrot.slane %v351_v23, 4  ;;  %v358_v32 = vsel %vm256_vm0, %v759_v1, 0.0  ;;  %v470_v35 = vrot.slane %v469_v62, 2 }
  0x33   : > { %v763_v36 = vpop.eup %762  ;;  %v346_v37 = vadd.f32 %v345_v2, %v344_v61  ;;  %v359_v38 = vrot.slane %v358_v32, 4  ;;  %v365_v39 = vsel %vm256_vm0, %v761_v28, 0.0  ;;  %v477_v40 = vrot.slane %v476_v25, 2 }
  0x34   : > { %v765_v41 = vpop.eup %764  ;;  %v340_v43 = vrot.slane %v339_v30, 2  ;;  %v353_v44 = vadd.f32 %v352_v31, %v351_v23  ;;  %v366_v45 = vrot.slane %v365_v39, 4  ;;  %v372_v46 = vsel %vm256_vm0, %v763_v36, 0.0 }
  0x35   : > { %v767_v47 = vpop.eup %766  ;;  %v347_v48 = vrot.slane %v346_v37, 2  ;;  %v360_v49 = vadd.f32 %v359_v38, %v358_v32  ;;  %v373_v50 = vrot.slane %v372_v46, 4  ;;  %v379_v51 = vsel %vm256_vm0, %v765_v41, 0.0 }
  0x36   : > { %v341_v4 = vadd.f32 %v340_v43, %v339_v30  ;;  %v354_v6 = vrot.slane %v353_v44, 2  ;;  %v367_v52 = vadd.f32 %v366_v45, %v365_v39  ;;  %v380_v53 = vrot.slane %v379_v51, 4 }
  0x37   : > { %v348_v7 = vadd.f32 %v347_v48, %v346_v37  ;;  %v361_v8 = vrot.slane %v360_v49, 2  ;;  %v374_v9 = vadd.f32 %v373_v50, %v372_v46  ;;  %v386_v15 = vsel %vm256_vm0, %v767_v47, 0.0 }
  0x38   : > { %v342_v16 = vrot.slane %v341_v4, 1  ;;  %v355_v20 = vadd.f32 %v354_v6, %v353_v44  ;;  %v368_v3 = vrot.slane %v367_v52, 2  ;;  %v381_v10 = vadd.f32 %v380_v53, %v379_v51 }
  0x39   : > { %v349_v57 = vrot.slane %v348_v7, 1  ;;  %v362_v11 = vadd.f32 %v361_v8, %v360_v49  ;;  %v375_v12 = vrot.slane %v374_v9, 2  ;;  %v387_v14 = vrot.slane %v386_v15, 4 }
  0x3a   : > { %v343_v17 = vadd.f32 %v342_v16, %v341_v4  ;;  %v356_v58 = vrot.slane %v355_v20, 1  ;;  %v369_v18 = vadd.f32 %v368_v3, %v367_v52  ;;  %v382_v26 = vrot.slane %v381_v10, 2 }
  0x3b   : > { %v350_v60 = vadd.f32 %v349_v57, %v348_v7  ;;  %v363_v61 = vrot.slane %v362_v11, 1  ;;  %v376_v1 = vadd.f32 %v375_v12, %v374_v9  ;;  %v388_v2 = vadd.f32 %v387_v14, %v386_v15 }
  0x3c   : > { %v357_v23 = vadd.f32 %v356_v58, %v355_v20  ;;  %v370_v28 = vrot.slane %v369_v18, 1  ;;  %v383_v30 = vadd.f32 %v382_v26, %v381_v10  ;;  %768 = vlog2.f32 %v343_v17 }
  0x3d   : > { %v364_v31 = vadd.f32 %v363_v61, %v362_v11  ;;  %v377_v32 = vrot.slane %v376_v1, 1  ;;  %v389_v36 = vrot.slane %v388_v2, 2  ;;  %770 = vlog2.f32 %v350_v60 }
  0x3e   : > { %v371_v37 = vadd.f32 %v370_v28, %v369_v18  ;;  %v384_v38 = vrot.slane %v383_v30, 1  ;;  %772 = vlog2.f32 %v357_v23  ;;  %v471_v39 = vadd.f32 %v470_v35, %v469_v62 }
  0x3f   : > { %v378_v41 = vadd.f32 %v377_v32, %v376_v1  ;;  %v390_v43 = vadd.f32 %v389_v36, %v388_v2  ;;  %774 = vlog2.f32 %v364_v31  ;;  %v478_v44 = vadd.f32 %v477_v40, %v476_v25 }
  0x40   : > { %v385_v45 = vadd.f32 %v384_v38, %v383_v30  ;;  %776 = vlog2.f32 %v371_v37  ;;  %v472_v46 = vrot.slane %v471_v39, 1  ;;  %v484_v47 = vrot.slane %v999_v27, 2 }
  0x41   : > { %v391_v48 = vrot.slane %v390_v43, 1  ;;  %778 = vlog2.f32 %v378_v41  ;;  %v479_v49 = vrot.slane %v478_v44, 1  ;;  %v490_v50 = vadd.f32 %v489_v59, %v990_v13 }
  0x42   : > { %780 = vlog2.f32 %v385_v45  ;;  %v1010_v51 = vadd.f32 %v472_v46, %v471_v39  ;;  %v485_v62 = vadd.f32 %v484_v47, %v999_v27  ;;  %v496_v35 = vrot.slane %v996_v0, 4 }
  0x43   : > { %v392_v25 = vadd.f32 %v391_v48, %v390_v43  ;;  %v1014_v40 = vadd.f32 %v479_v49, %v478_v44  ;;  %v491_v4 = vrot.slane %v490_v50, 2  ;;  %v502_v6 = vsel %vm256_vm0, %v978_v54, 0.0 }
  0x44   : > { %v486_v52 = vrot.slane %v485_v62, 1  ;;  %v497_v53 = vadd.f32 %v496_v35, %v996_v0  ;;  %v503_v7 = vrot.slane %v502_v6, 4  ;;  %v509_v13 = vsel %vm256_vm0, %v981_v55, 0.0 }
  0x45   : > { %782 = vlog2.f32 %v392_v25  ;;  %v492_v59 = vadd.f32 %v491_v4, %v490_v50  ;;  %v510_v8 = vrot.slane %v509_v13, 4  ;;  %v516_v27 = vsel %vm256_vm0, %v984_v56, 0.0 }
  0x46   : > { %v769_v9 = vpop.eup %768  ;;  %v487_v15 = vadd.f32 %v486_v52, %v485_v62  ;;  %v498_v16 = vrot.slane %v497_v53, 2  ;;  %v504_v20 = vadd.f32 %v503_v7, %v502_v6  ;;  %v517_v3 = vrot.slane %v516_v27, 4 }
  0x47   : > { %v771_v10 = vpop.eup %770  ;;  %v394_v54 = vmul.f32 0.6931472, %v769_v9  ;;  %v493_v57 = vrot.slane %v492_v59, 1  ;;  %v511_v11 = vadd.f32 %v510_v8, %v509_v13 }
  0x48   : > { %v773_v0 = vpop.eup %772  ;;  %v396_v12 = vmul.f32 0.6931472, %v771_v10  ;;  %v499_v55 = vadd.f32 %v498_v16, %v497_v53  ;;  %v505_v14 = vrot.slane %v504_v20, 2  ;;  %v518_v17 = vadd.f32 %v517_v3, %v516_v27 }
  0x49   : > { %v775_v58 = vpop.eup %774  ;;  %v398_v18 = vmul.f32 0.6931472, %v773_v0  ;;  %v409_v56 = vadd.f32 %v394_v54, %v902_v63  ;;  %v494_v26 = vadd.f32 %v493_v57, %v492_v59  ;;  %v512_v60 = vrot.slane %v511_v11, 2 }
  0x4a   : > { %v777_v61 = vpop.eup %776  ;;  %v400_v1 = vmul.f32 0.6931472, %v775_v58  ;;  %v410_v2 = vadd.f32 %v396_v12, %v908_v5  ;;  %v500_v23 = vrot.slane %v499_v55, 1  ;;  %v506_v28 = vadd.f32 %v505_v14, %v504_v20 }
  0x4b   : > { %v779_v30 = vpop.eup %778  ;;  %v402_v31 = vmul.f32 0.6931472, %v777_v61  ;;  %v411_v32 = vadd.f32 %v398_v18, %v910_v19  ;;  %v513_v36 = vadd.f32 %v512_v60, %v511_v11  ;;  %v519_v37 = vrot.slane %v518_v17, 2 }
  0x4c   : > { %v781_v38 = vpop.eup %780  ;;  %v404_v39 = vmul.f32 0.6931472, %v779_v30  ;;  %v412_v41 = vadd.f32 %v400_v1, %v912_v22  ;;  %v501_v43 = vadd.f32 %v500_v23, %v499_v55  ;;  %v507_v63 = vrot.slane %v506_v28, 1 }
  0x4d   : > { %v406_v44 = vmul.f32 0.6931472, %v781_v38  ;;  %v413_v45 = vadd.f32 %v402_v31, %v914_v24  ;;  %v514_v46 = vrot.slane %v513_v36, 1  ;;  %v520_v5 = vadd.f32 %v519_v37, %v518_v17 }
  0x4e   : > { %v414_v47 = vadd.f32 %v404_v39, %v918_v29  ;;  %v508_v48 = vadd.f32 %v507_v63, %v506_v28  ;;  %v524_v49 = vsub.f32 %v409_v56, %v1010_v51  ;;  %v525_v19 = vsub.f32 %v410_v2, %v1014_v40 }
  0x4f   : > { %v783_v50 = vpop.eup %782  ;;  %v415_v62 = vadd.f32 %v406_v44, %v928_v34  ;;  %v515_v35 = vadd.f32 %v514_v46, %v513_v36  ;;  %v521_v22 = vrot.slane %v520_v5, 1  ;;  %v526_v25 = vsub.f32 %v411_v32, %v487_v15 }
  0x50   : > { %v408_v4 = vmul.f32 0.6931472, %v783_v50  ;;  %v527_v6 = vsub.f32 %v412_v41, %v494_v26  ;;  %v528_v52 = vsub.f32 %v413_v45, %v501_v43  ;;  %v529_v24 = vsub.f32 %v414_v47, %v508_v48 }
  0x51   : > { %v522_v29 = vadd.f32 %v521_v22, %v520_v5  ;;  %v530_v53 = vsub.f32 %v415_v62, %v515_v35  ;;  %v540_v7 = vcombine.low %v524_v49, %v525_v19  ;;  %v809_v51 = vmov 0.0  }
  0x52   : > { %v722_v40 = vsel %vm523_vm9, 1.0, %v809_v51  ;;  %v416_v34 = vadd.f32 %v408_v4, %v934_v42  ;;  %v541_v13 = vcombine.low %v526_v25, %v527_v6  ;;  %v542_v59 = vcombine.low %v528_v52, %v529_v24 }
  0x53   : > { %v550_v8 = vrot.slane %v540_v7, %v881_v21  ;;  %598 = vst [vmem:[%s240_s26] sm:$0xff] %v722_v40 }
  0x54   : > { %v531_v27 = vsub.f32 %v416_v34, %v522_v29  ;;  %v557_v9 = vrot.slane %v541_v13, %v881_v21  ;;  %v564_v16 = vrot.slane %v542_v59, %v881_v21 }
  0x56   : > { %v543_v15 = vcombine.low %v530_v53, %v531_v27  ;;  %v572_v20 = vcombine.low %v550_v8, %v557_v9 }
  0x58   : > { %v571_v3 = vrot.slane %v543_v15, %v881_v21  ;;  %v580_v54 = vrot.slane %v572_v20, %v881_v21 }
  0x5a   : > { %v573_v10 = vcombine.low %v564_v16, %v571_v3 }
  0x5c   : > { %v587_v57 = vrot.slane %v573_v10, %v881_v21 }
  0x5e   : > { %v588_v42 = vcombine.low %v580_v54, %v587_v57 }
  0x60   : > { %v590_v11 = vsel %vm523_vm9, %v588_v42, 0.0 }
  0x61   : > { %593 = vst [vmem:[%s236_s29] sm:$0xff] %v590_v11 }
  0x62 PF: > { %s14_s14 = sadd.s32 1, %s806_s14   ;;  %s1065_s12 = smov %s802_s13 }
  0x63   : > { %p11_p5 = scmp.ge.s32.totalorder %s14_s14, 4   ;;  %s1066_s13 = smov %s1068_s15 }
  0x65   :  { %13 = sbr.rel (!%p11_p5) target bundleno = 2 (0x2), region = 77 }

</bundles_post_ra>
